<compile_context>
chip_gen: v6e
topology: v6e:2x2x1
jax: 0.10.0
libtpu: 0.0.40
codegen_flags: <defaults>
</compile_context>

<pallas_src>
import functools

import jax
import jax.numpy as jnp
from jax.experimental import pallas as pl
from jax.experimental.pallas import tpu as pltpu


def _cdiv(a, b):
    return (a + b - 1) // b


def _round_up(a, b):
    return _cdiv(a, b) * b


# -----------------------------------------------------------------------------
# Pallas kernel: fused 2-layer MLP  y = relu(x @ W1 + b1) @ W2 + b2
#   x_ref : (tm, d_model)     input dtype (f32) -> cast to bf16 in-kernel
#   w1_ref: (d_model, d_ffn)  bf16 (resident in VMEM across grid steps)
#   b1_ref: (1, d_ffn)        f32
#   w2_ref: (d_ffn, d_out)    bf16 (d_out = 3; MXU pads N internally)
#   b2_ref: (1, d_out)        f32
#   o_ref : (tm, d_out)       f32 — narrow store, exact output, no wrapper slice
# -----------------------------------------------------------------------------
def _mlp_kernel(x_ref, w1_ref, b1_ref, w2_ref, b2_ref, o_ref):
    # In-kernel f32 -> bf16 cast (VPU) avoids a separate XLA cast/pad pre-pass
    # that would re-stream x through HBM.
    x = x_ref[...].astype(w1_ref.dtype)
    h = jnp.dot(x, w1_ref[...], preferred_element_type=jnp.float32)   # MXU, f32 acc
    h = jnp.maximum(h + b1_ref[...], 0.0)                             # bias+ReLU in f32
    y = jnp.dot(h.astype(w2_ref.dtype), w2_ref[...],
                preferred_element_type=jnp.float32)                   # MXU, narrow N
    o_ref[...] = (y + b2_ref[...]).astype(o_ref.dtype)


@functools.partial(jax.jit, static_argnames=("tm_max",))
def mlp_pallas(x, w1, b1, w2, b2, *, tm_max=1024):
    """Fused MLP: relu(x @ W1 + b1) @ W2 + b2 in a single pallas_call.

    x : (M, d_model) f32/bf16; w1: (d_model, d_ffn) bf16; b1: (1, d_ffn) f32;
    w2: (d_ffn, d_out) bf16;   b2: (1, d_out) f32.  Returns (M, d_out) f32.
    Arbitrary M is handled via a masked boundary block (no pre-padding).
    """
    M, d_model = x.shape
    d_ffn = w1.shape[1]
    d_out = w2.shape[1]

    # Row tile: >= 2 grid steps whenever M allows (v7x megacore gets both TCs
    # working); for large M use tm_max-row tiles to amortize per-step overhead.
    if M <= 2 * tm_max:
        tm = max(8, _round_up(_cdiv(M, 2), 8))
    else:
        tm = tm_max
    tm = min(tm, _round_up(M, 8))
    grid = (_cdiv(M, tm),)            # ragged tail -> masked boundary block

    cost = pl.CostEstimate(
        flops=2 * M * (d_model * d_ffn + d_ffn * d_out),
        transcendentals=0,
        bytes_accessed=(x.size * x.dtype.itemsize
                        + w1.size * w1.dtype.itemsize
                        + b1.size * b1.dtype.itemsize
                        + w2.size * w2.dtype.itemsize
                        + b2.size * b2.dtype.itemsize
                        + M * d_out * 4),
    )

    # VMEM @ tm=1024, d_model=256, d_ffn=1024: x 2x1 MiB, W1 2x0.5 MiB,
    # h f32+bf16 ~6 MiB, W2/b/out < 1 MiB  => ~10 MiB, far under 32 MiB
    # (v7x has 64 MiB physical per TC, so this budget is safe everywhere).
    return pl.pallas_call(
        _mlp_kernel,
        out_shape=jax.ShapeDtypeStruct((M, d_out), jnp.float32),
        grid=grid,
        in_specs=[
            pl.BlockSpec((tm, d_model), lambda i: (i, 0)),     # x row tile
            pl.BlockSpec((d_model, d_ffn), lambda i: (0, 0)),  # W1 (resident)
            pl.BlockSpec((1, d_ffn), lambda i: (0, 0)),        # b1 (resident)
            pl.BlockSpec((d_ffn, d_out), lambda i: (0, 0)),    # W2 (resident)
            pl.BlockSpec((1, d_out), lambda i: (0, 0)),        # b2 (resident)
        ],
        out_specs=pl.BlockSpec((tm, d_out), lambda i: (i, 0)),
        compiler_params=pltpu.CompilerParams(
            dimension_semantics=("parallel",),     # megacore row-sharding (v7x)
            vmem_limit_bytes=32 * 1024 * 1024,     # explicit, v7x-safe budget
        ),
        cost_estimate=cost,
    )(x, w1, b1, w2, b2)


# -----------------------------------------------------------------------------
# One-time weight preparation (hoisted out of the per-forward path)
# -----------------------------------------------------------------------------
def prepare_traj_refiner_params(raw, compute_dtype=jnp.bfloat16):
    return {
        "w1": jnp.asarray(raw["w1"], compute_dtype),
        "b1": jnp.asarray(raw["b1"], jnp.float32).reshape(1, -1),
        "w2": jnp.asarray(raw["w2"], compute_dtype),
        "b2": jnp.asarray(raw["b2"], jnp.float32).reshape(1, -1),
    }


# -----------------------------------------------------------------------------
# Traj_refiner forward (traj_bev=False path)
# -----------------------------------------------------------------------------
def traj_refiner_forward(params, bev_feature, proposal_list, image_feature,
                         *, poses_num, state_size=3):
    """bev_feature: (B, N_tokens, d_model) -> (bev_feature, proposal_list)."""
    B, N, d_model = bev_feature.shape
    x = bev_feature.reshape(B * N, d_model)
    y = mlp_pallas(x, params["w1"], params["b1"], params["w2"], params["b2"])
    proposals = y.reshape(B, -1, poses_num, state_size)
    proposal_list = proposal_list + [proposals]
    # TODO(synk): Bev_refiner branch (config.traj_bev=True) is an external
    # module not defined in traj_refiner.py; bev_feature passes through.
    return bev_feature, proposal_list


# -----------------------------------------------------------------------------
# Deterministic parameter init (shapes from MLP(tf_d_model, tf_d_ffn, 3))
# -----------------------------------------------------------------------------
def init_params(key, d_model, d_ffn, d_out):
    k1, k2, k3, k4 = jax.random.split(key, 4)
    s1 = 1.0 / jnp.sqrt(d_model)
    s2 = 1.0 / jnp.sqrt(d_ffn)
    return {
        "w1": jax.random.uniform(k1, (d_model, d_ffn), jnp.float32, -s1, s1),
        "b1": jax.random.uniform(k2, (d_ffn,), jnp.float32, -s1, s1),
        "w2": jax.random.uniform(k3, (d_ffn, d_out), jnp.float32, -s2, s2),
        "b2": jax.random.uniform(k4, (d_out,), jnp.float32, -s2, s2),
    }


if __name__ == "__main__":
    # Small synthetic config (mirrors tf_d_model / tf_d_ffn / state_size=3).
    # N_tokens = 15 and M = 30 deliberately do NOT divide the 16-row tile, so
    # the masked boundary-block path (no pre-padding) is exercised.
    B = 2
    proposal_num = 3
    poses_num = 5
    state_size = 3
    d_model = 128
    d_ffn = 256
    N_tokens = proposal_num * poses_num  # 15 -> M = 30 rows

    key = jax.random.PRNGKey(0)
    kx, kp, kimg = jax.random.split(key, 3)

    bev_feature = jax.random.normal(kx, (B, N_tokens, d_model), jnp.float32)
    image_feature = jax.random.normal(kimg, (B, 8, d_model), jnp.float32)  # unused (traj_bev=False)

    raw_params = init_params(kp, d_model, d_ffn, state_size)
    params = prepare_traj_refiner_params(raw_params)  # one-time weight prep

    bev_out, proposal_list = traj_refiner_forward(
        params, bev_feature, [], image_feature,
        poses_num=poses_num, state_size=state_size)

    proposals = proposal_list[-1]
    jax.block_until_ready(proposals)
    jax.block_until_ready(bev_out)

    # ---- reference checks ---------------------------------------------------
    x_flat = bev_feature.reshape(B * N_tokens, d_model)

    # (a) bf16-matmul reference matching the kernel's numerics (tight tolerance)
    xb = x_flat.astype(jnp.bfloat16)
    h_ref = jnp.dot(xb, params["w1"], preferred_element_type=jnp.float32) + params["b1"]
    h_ref = jnp.maximum(h_ref, 0.0).astype(jnp.bfloat16)
    ref_bf16 = jnp.dot(h_ref, params["w2"], preferred_element_type=jnp.float32) + params["b2"]
    ref_bf16 = ref_bf16.reshape(B, -1, poses_num, state_size)

    # (b) full-f32 reference (loose tolerance: bf16 operand rounding only)
    ref_f32 = (jnp.maximum(x_flat @ raw_params["w1"] + raw_params["b1"], 0.0)
               @ raw_params["w2"] + raw_params["b2"])
    ref_f32 = ref_f32.reshape(B, -1, poses_num, state_size)

    assert proposals.dtype == jnp.float32
    assert proposals.shape == (B, proposal_num, poses_num, state_size)
    assert bev_out.shape == bev_feature.shape
    assert jnp.allclose(proposals, ref_bf16, rtol=2e-3, atol=2e-3)
    assert jnp.allclose(proposals, ref_f32, rtol=5e-2, atol=5e-2)

    print("KERNEL_OK")
</pallas_src>

<mosaic_0001>
module attributes {stable_mosaic.version = 11 : i64} {
  func.func @_mlp_kernel(%arg0: i32, %arg1: memref<16x128xf32, #tpu.memory_space<vmem>>, %arg2: memref<128x256xbf16, #tpu.memory_space<vmem>>, %arg3: memref<1x256xf32, #tpu.memory_space<vmem>>, %arg4: memref<256x3xbf16, #tpu.memory_space<vmem>>, %arg5: memref<1x3xf32, #tpu.memory_space<vmem>>, %arg6: memref<16x3xf32, #tpu.memory_space<vmem>>) attributes {dimension_semantics = [#tpu.dimension_semantics<parallel>], iteration_bounds = array<i64: 2>, scalar_prefetch = 0 : i64, scratch_operands = 0 : i64, tpu.core_type = #tpu.core_type<tc>, window_params = [{transform_indices = @transform_0, window_bounds = array<i64: 16, 128>}, {pipeline_mode = #tpu.pipeline_mode<synchronous>, transform_indices = @transform_1, window_bounds = array<i64: 128, 256>}, {pipeline_mode = #tpu.pipeline_mode<synchronous>, transform_indices = @transform_2, window_bounds = array<i64: 1, 256>}, {pipeline_mode = #tpu.pipeline_mode<synchronous>, transform_indices = @transform_3, window_bounds = array<i64: 256, 3>}, {pipeline_mode = #tpu.pipeline_mode<synchronous>, transform_indices = @transform_4, window_bounds = array<i64: 1, 3>}, {transform_indices = @transform_5, window_bounds = array<i64: 16, 3>}]} {
    %c0 = arith.constant 0 : index
    %c0_0 = arith.constant 0 : index
    %0 = vector.load %arg1[%c0, %c0_0] : memref<16x128xf32, #tpu.memory_space<vmem>>, vector<16x128xf32>
    %1 = arith.truncf %0 : vector<16x128xf32> to vector<16x128xbf16>
    %c0_1 = arith.constant 0 : index
    %c0_2 = arith.constant 0 : index
    %2 = vector.load %arg2[%c0_1, %c0_2] : memref<128x256xbf16, #tpu.memory_space<vmem>>, vector<128x256xbf16>
    %cst = arith.constant dense<0.000000e+00> : vector<16x256xf32>
    %3 = tpu.matmul %1, %2, %cst {dimension_numbers = #tpu.dot_dimension_numbers<[1], [0], [0], [1], [0, 0, 1, 1], [], []>} : vector<16x128xbf16>, vector<128x256xbf16>, vector<16x256xf32> -> vector<16x256xf32>
    %c0_3 = arith.constant 0 : index
    %c0_4 = arith.constant 0 : index
    %4 = vector.load %arg3[%c0_3, %c0_4] : memref<1x256xf32, #tpu.memory_space<vmem>>, vector<1x256xf32>
    %5 = vector.broadcast %4 : vector<1x256xf32> to vector<16x256xf32>
    %6 = arith.addf %3, %5 : vector<16x256xf32>
    %cst_5 = arith.constant 0.000000e+00 : f32
    %7 = vector.broadcast %cst_5 : f32 to vector<16x256xf32>
    %8 = arith.maximumf %6, %7 : vector<16x256xf32>
    %9 = arith.truncf %8 : vector<16x256xf32> to vector<16x256xbf16>
    %c0_6 = arith.constant 0 : index
    %c0_7 = arith.constant 0 : index
    %10 = vector.load %arg4[%c0_6, %c0_7] : memref<256x3xbf16, #tpu.memory_space<vmem>>, vector<256x3xbf16>
    %cst_8 = arith.constant dense<0.000000e+00> : vector<16x3xf32>
    %11 = tpu.matmul %9, %10, %cst_8 {dimension_numbers = #tpu.dot_dimension_numbers<[1], [0], [0], [1], [0, 0, 1, 1], [], []>} : vector<16x256xbf16>, vector<256x3xbf16>, vector<16x3xf32> -> vector<16x3xf32>
    %c0_9 = arith.constant 0 : index
    %c0_10 = arith.constant 0 : index
    %12 = vector.load %arg5[%c0_9, %c0_10] : memref<1x3xf32, #tpu.memory_space<vmem>>, vector<1x3xf32>
    %13 = vector.broadcast %12 : vector<1x3xf32> to vector<16x3xf32>
    %14 = arith.addf %11, %13 : vector<16x3xf32>
    %c0_11 = arith.constant 0 : index
    %c0_12 = arith.constant 0 : index
    %15 = vector.load %arg6[%c0_11, %c0_12] : memref<16x3xf32, #tpu.memory_space<vmem>>, vector<16x3xf32>
    tpu.vector_store %arg6[%c0_11, %c0_12], %14 {strides = array<i32>} : memref<16x3xf32, #tpu.memory_space<vmem>>, vector<16x3xf32>,
    return
  }
  func.func @transform_0(%arg0: i32) -> (i32, i32) {
    %c0_i32 = arith.constant 0 : i32
    %c0_i32_0 = arith.constant 0 : i32
    return %arg0, %c0_i32 : i32, i32
  }
  func.func @transform_1(%arg0: i32) -> (i32, i32) {
    %c0_i32 = arith.constant 0 : i32
    %c0_i32_0 = arith.constant 0 : i32
    %c0_i32_1 = arith.constant 0 : i32
    return %c0_i32, %c0_i32_0 : i32, i32
  }
  func.func @transform_2(%arg0: i32) -> (i32, i32) {
    %c0_i32 = arith.constant 0 : i32
    %c0_i32_0 = arith.constant 0 : i32
    %c0_i32_1 = arith.constant 0 : i32
    return %c0_i32, %c0_i32_0 : i32, i32
  }
  func.func @transform_3(%arg0: i32) -> (i32, i32) {
    %c0_i32 = arith.constant 0 : i32
    %c0_i32_0 = arith.constant 0 : i32
    %c0_i32_1 = arith.constant 0 : i32
    return %c0_i32, %c0_i32_0 : i32, i32
  }
  func.func @transform_4(%arg0: i32) -> (i32, i32) {
    %c0_i32 = arith.constant 0 : i32
    %c0_i32_0 = arith.constant 0 : i32
    %c0_i32_1 = arith.constant 0 : i32
    return %c0_i32, %c0_i32_0 : i32, i32
  }
  func.func @transform_5(%arg0: i32) -> (i32, i32) {
    %c0_i32 = arith.constant 0 : i32
    %c0_i32_0 = arith.constant 0 : i32
    return %arg0, %c0_i32 : i32, i32
  }
}

</mosaic_0001>

<bundles_post_ra>
// kernel: mlp_pallas.1
= control target key start
LH: loop header
LB: loop body
LE: loop exit
PB: predicated region body
PF: predicated region fallthrough
CT: control target
= control target key end

     0   :  { %10 = vsyncpa [#allocation3], 0  ;;  %s1112_s0 = inlined_call_operand.hbm [shape: f32[30,128], index: 0, kind: input, shape index: {}]   ;;  %s1113_s1 = inlined_call_operand.vmem [shape: bf16[128,256], index: 1, kind: input, shape index: {}]   ;;  %s1114_s2 = inlined_call_operand.vmem [shape: f32[1,256], index: 2, kind: input, shape index: {}]   ;;  %s1115_s3 = inlined_call_operand.vmem [shape: bf16[256,3], index: 3, kind: input, shape index: {}]   ;;  %s1116_s4 = inlined_call_operand.vmem [shape: f32[1,3], index: 4, kind: input, shape index: {}]   ;;  %s1117_s5 = inlined_call_operand.vmem [shape: f32[30,3], index: 5, kind: output, shape index: {}]  }
   0x1   :  { %12 = vsyncpa [#allocation3 + $0x1], 0  ;;  %s903_s18 = smov 0   ;;  %s905_s19 = smov 0  }
   0x2   :  { %s907_s20 = smov 0   ;;  %s909_s21 = smov 0  }
   0x3 LB: > { %s654_s22 = sadd.s32 4294967295, %s867_s21   ;;  %s923_s23 = sadd.s32 1, %s867_s21   ;;  %s867_s21 = sphi %s909_s21, %s1126_s21   ;;  %s863_s20 = sphi %s907_s20, %s1125_s20   ;;  %s859_s19 = sphi %s905_s19, %s1124_s19   ;;  %s855_s18 = sphi %s903_s18, %s1123_s18  }
   0x4   : > { %s22_s24 = ssub.s32 %s867_s21, %s923_s23  ;;  %s25_s25 = sadd.s32 1, %s863_s20 }
   0x5   : > { %p23_p0 = scmp.eq.s32.totalorder %s22_s24, 0  ;;  %p32_p1 = scmp.ne.s32.totalorder %s863_s20, %s859_s19 }
   0x6   : > { %p33_p2 = scmp.eq.s32.totalorder %s867_s21, 0  ;;  %p38_p3 = scmp.ne.s32.totalorder %s859_s19, %s855_s18 }
   0x7   : > { %s933_s26 = scalar_select %p23_p0, %s863_s20, %s25_s25  }
   0x8   : > { %p34_p4 = por %p33_p2, %p32_p1  ;;  %p39_p5 = scmp.eq.s32.totalorder %s654_s22, 0 }
   0x9   : > { %p729_p6 = scmp.lt.s32.totalorder %s867_s21, 2  ;;  %s184_s28 = sand.u32 1, %s863_s20  }
   0xa   : > { %p938_p7 = por %p39_p5, %p38_p3  ;;  %s658_s29 = sshll.u32 %s184_s28, 4 }
   0xb   : > { %s700_s30 = sshll.u32 %s867_s21, 8  ;;  %s188_s9 = scalar_lea.vmem [#allocation2], %s658_s29 }
   0xc   : > { %s1119_s27 = scalar_select %p938_p7, 1, 0 }
   0xd   : > { %s947_s8 = scalar_lea.hbm %s1112_s0, %s700_s30  ;;  %s195_s10 = sshll.u32 %s188_s9, 4  ;;  %s949_s10 = int_to_ptr.vmem [resolvable:$true] %s195_s10 }
   0xe   : > { %p951_p8 = pnand %p729_p6, %p34_p4  ;;  %s956_s12 = scalar_lea.sflag [#allocation3], %s184_s28 }
   0xf   : > { %s805_s13 = scalar_lea.hbm %s947_s8, 256  ;;  %s810_s16 = scalar_lea.hbm %s1112_s0, 512 }
  0x10   : > { %p806_p10 = scmp.ne.s32.totalorder %s947_s8, %s805_s13  ;;  %p807_p11 = pneg %p951_p8 }
  0x11   : > { %p811_p0 = scmp.lt.s32.totalorder %s947_s8, %s1112_s0  ;;  %p812_p1 = scmp.lt.s32.totalorder %s810_s16, %s805_s13 }
  0x12   : > { %p808_p12 = pnand %p807_p11, %p806_p10 }
  0x13   : > { %p813_p2 = por %p812_p1, %p811_p0 }
  0x14   : > { %p809_p13 = pneg %p808_p12 }
  0x16   : > { %p814_p3 = pnand %p813_p2, %p809_p13 }
  0x18   : > { %817 = shalt.err (!%p814_p3)
}
  0x19   : > { %s818_s24 = scalar_lea.vmem %s949_s10, 256  ;;  %s869_s25 = smov [#allocation2]  }
  0x1a   : > { %p819_p4 = scmp.ne.s32.totalorder %s949_s10, %s818_s24  ;;  %s823_s28 = sshll.u32 %s869_s25, 4  ;;  %s824_s28 = int_to_ptr.vmem [resolvable:$false] %s823_s28 }
  0x1b   : > { %s825_s29 = scalar_lea.vmem %s824_s28, 512  ;;  %p826_p10 = scmp.lt.s32.totalorder %s949_s10, %s824_s28 }
  0x1c   : > { %p821_p5 = pnand %p819_p4, %p807_p11  ;;  %p827_p12 = scmp.lt.s32.totalorder %s825_s29, %s818_s24 }
  0x1e   : > { %p822_p6 = pneg %p821_p5  ;;  %p828_p9 = por %p827_p12, %p826_p10 }
  0x20   : > { %p829_p7 = pnand %p828_p9, %p822_p6 }
  0x22   : > { %832 = shalt.err (!%p829_p7)
}
  0x23   : > { %s870_s30 = smov 128   ;;  %s871_s6 = smov 8  }
  0x24   : > { %728 = dma.hbm_to_vmem [thread:$0]  (!%p951_p8), %s947_s8, 256, %s949_s10, %s956_s12, %s870_s30, %s870_s30, %s871_s6  }
  0x25   : > { %p203_p11 = scmp.lt.s32.totalorder %s867_s21, 3  ;;  %p1121_p13 = scmp.ge.s32.totalorder %s867_s21, 1 }
  0x27   : > { %p204_p0 = pnand %p1121_p13, %p203_p11 }
  0x28   : > { %s209_s7 = sand.u32 (!%p204_p0), 1, %s859_s19   ;;  %p1122_p7 = scmp.ne.s32.totalorder (!%p204_p0), %s1119_s27, 0 }
  0x29   : > { %207 = sbr.rel (%p204_p0) target bundleno = 490 (0x1ea), region = 40  ;;  %s981_s9 = sshll.u32 (!%p204_p0), %s209_s7, 4 }
  0x2a   : > { %s210_s13 = scalar_lea.sflag (!%p204_p0), [#allocation3], %s209_s7  ;;  %s213_s14 = scalar_lea.vmem (!%p204_p0), [#allocation2], %s981_s9 }
  0x2e   : > { %850 = dma.done.wait (%p1122_p7), %s210_s13, 256  }
  0x2f   : > { %852 = vsyncadd (%p1122_p7), %s210_s13, 4294967040  ;;  %v872_v0 = vmov 0   ;;  %v765_v1 = vld [vmem:[%s1113_s1 + $0x74] ss:$8 sps:$4 sm:$0xff]   ;;  %v767_v2 = vld [vmem:[%s1113_s1 + $0x70] ss:$8 sps:$4 sm:$0xff]   ;;  %v269_v36 = vlaneseq }
  0x30   : > { %391 = vmatprep.mubr.bf16.mxu0 %v872_v0  ;;  %359 = vmatprep.subr.bf16.mxu0 %v765_v1  ;;  %v768_v3 = vld [vmem:[%s1113_s1 + $0x64] ss:$8 sps:$4 sm:$0xff]   ;;  %v770_v4 = vld [vmem:[%s1113_s1 + $0x60] ss:$8 sps:$4 sm:$0xff]   ;;  %v771_v5 = vld [vmem:[%s1113_s1 + $0x54] ss:$8 sps:$4 sm:$0xff]  }
  0x31   : > { %360 = vmatpush1.bf16.msra.mxu0 %v767_v2  ;;  %v773_v6 = vld [vmem:[%s1113_s1 + $0x50] ss:$8 sps:$4 sm:$0xff]   ;;  %v774_v7 = vld [vmem:[%s1113_s1 + $0x44] ss:$8 sps:$4 sm:$0xff]   ;;  %v776_v8 = vld [vmem:[%s1113_s1 + $0x40] ss:$8 sps:$4 sm:$0xff]  }
  0x32   : > { %361 = vmatprep.subr.bf16.mxu0 %v768_v3  ;;  %v777_v9 = vld [vmem:[%s1113_s1 + $0x34] ss:$8 sps:$4 sm:$0xff]   ;;  %v779_v11 = vld [vmem:[%s1113_s1 + $0x30] ss:$8 sps:$4 sm:$0xff]   ;;  %v780_v13 = vld [vmem:[%s1113_s1 + $0x24] ss:$8 sps:$4 sm:$0xff]  }
  0x33   : > { %v789_v10 = vld [vmem:[%s1115_s3 + $0x78] sm:$0xff]   ;;  %v791_v14 = vld [vmem:[%s1115_s3 + $0x70] sm:$0xff]   ;;  %v793_v16 = vld [vmem:[%s1115_s3 + $0x68] sm:$0xff]   ;;  %v270_v37 = vshrl.u32 %v269_v36, 7  ;;  %s663_s30 = sshll.u32 %s654_s22, 1  ;;  %vm584_vm0 = vcmask 23552  }
  0x34   : > { %v790_v12 = vld [vmem:[%s1115_s3 + $0x38] sm:$0xff]   ;;  %701 = vmatprep.subr.bf16.mxu1 %v789_v10  ;;  %v792_v15 = vld [vmem:[%s1115_s3 + $0x30] sm:$0xff]   ;;  %v782_v17 = vld [vmem:[%s1113_s1 + $0x20] ss:$8 sps:$4 sm:$0xff]   ;;  %p242_p8 = scmp.lt.s32.totalorder %s663_s30, 3 }
  0x35   : > { %362 = vmatpush1.bf16.msra.mxu0 %v770_v4  ;;  %702 = vmatpush3.bf16.msra.mxu1 %v790_v12  ;;  %v783_v18 = vld [vmem:[%s1113_s1 + $0x14] ss:$8 sps:$4 sm:$0xff]   ;;  %v794_v19 = vld [vmem:[%s1115_s3 + $0x28] sm:$0xff]   ;;  %v795_v20 = vld [vmem:[%s1115_s3 + $0x60] sm:$0xff]   ;;  %v275_v38 = vsub.s32 1, %v270_v37  ;;  %v271_v39 = vsub.s32 0, %v270_v37 }
  0x36   : > { %363 = vmatprep.subr.bf16.mxu0 %v771_v5  ;;  %703 = vmatprep.subr.bf16.mxu1 %v791_v14  ;;  %v785_v21 = vld [vmem:[%s1113_s1 + $0x10] ss:$8 sps:$4 sm:$0xff]   ;;  %v796_v22 = vld [vmem:[%s1115_s3 + $0x20] sm:$0xff]   ;;  %v801_v32 = vld [vmem:[%s1115_s3 + $0x48] sm:$0xff]   ;;  %s1128_s30 = smov (!%p242_p8, %s663_s30), 3 }
  0x37   : > { %v786_v23 = vld [vmem:[%s1113_s1 + $0x4] ss:$8 sps:$4 sm:$0xff]   ;;  %v797_v24 = vld [vmem:[%s1115_s3 + $0x58] sm:$0xff]   ;;  %v788_v25 = vld [vmem:[%s1113_s1] ss:$8 sps:$4 sm:$0xff]   ;;  %s664_s6 = sshll.u32 %s1128_s30, 3 }
  0x38   : > { %v248_v26 = vld [vmem:[%s213_s14] sm:$0xff]  ;;  %v249_v27 = vld [vmem:[%s213_s14 + $0x8] sm:$0xff]  ;;  %s245_s11 = scalar_lea.vmem %s1117_s5, %s664_s6 }
  0x39   : > { %364 = vmatpush1.bf16.msra.mxu0 %v773_v6  ;;  %704 = vmatpush3.bf16.msra.mxu1 %v792_v15  ;;  %v798_v28 = vld [vmem:[%s1115_s3 + $0x18] sm:$0xff]   ;;  %v250_v29 = vpack.c.bf16 %v249_v27, %v248_v26  ;;  %v799_v30 = vld [vmem:[%s1115_s3 + $0x50] sm:$0xff]   ;;  %v802_v33 = vld [vmem:[%s1115_s3 + $0x8] sm:$0xff]  }
  0x3a   : > { %365 = vmatprep.subr.bf16.mxu0 %v774_v7  ;;  %705 = vmatprep.subr.bf16.mxu1 %v793_v16  ;;  %v800_v31 = vld [vmem:[%s1115_s3 + $0x10] sm:$0xff]   ;;  %v803_v34 = vld [vmem:[%s1115_s3 + $0x40] sm:$0xff]  }
  0x3b   : > { %v804_v35 = vld [vmem:[%s1115_s3] sm:$0xff]  }
  0x3c   : > { %v267_v40 = vld [vmem:[%s1114_s2] sm:$0x3] }
  0x3d   : > { %366 = vmatpush1.bf16.msra.mxu0 %v776_v8  ;;  %706 = vmatpush3.bf16.msra.mxu1 %v794_v19  ;;  %v276_v42 = vrot.slane %v267_v40, %v275_v38  ;;  %v272_v43 = vrot.slane %v267_v40, %v271_v39  ;;  %v681_v58 = vld [vmem:[%s1116_s4] ss:$0 sm:$0xff] }
  0x3e   : > { %367 = vmatprep.subr.bf16.mxu0 %v777_v9  ;;  %707 = vmatprep.subr.bf16.mxu1 %v795_v20 }
  0x41   : > { %368 = vmatpush1.bf16.msra.mxu0 %v779_v11  ;;  %708 = vmatpush3.bf16.msra.mxu1 %v796_v22 }
  0x42   : > { %369 = vmatprep.subr.bf16.mxu0 %v780_v13  ;;  %709 = vmatprep.subr.bf16.mxu1 %v797_v24 }
  0x45   : > { %370 = vmatpush1.bf16.msra.mxu0 %v782_v17  ;;  %710 = vmatpush3.bf16.msra.mxu1 %v798_v28 }
  0x46   : > { %371 = vmatprep.subr.bf16.mxu0 %v783_v18  ;;  %711 = vmatprep.subr.bf16.mxu1 %v799_v30 }
  0x49   : > { %372 = vmatpush1.bf16.msra.mxu0 %v785_v21  ;;  %712 = vmatpush3.bf16.msra.mxu1 %v800_v31 }
  0x4a   : > { %373 = vmatprep.subr.bf16.mxu0 %v786_v23  ;;  %713 = vmatprep.subr.bf16.mxu1 %v801_v32 }
  0x4d   : > { %374 = vmatpush1.bf16.msra.mxu0 %v788_v25  ;;  %714 = vmatpush3.bf16.msra.mxu1 %v802_v33 }
  0x4e   : > { %715 = vmatprep.subr.bf16.mxu1 %v803_v34 }
  0x50   : > { %392 = vmatmul.mubr.bf16.vlgmr.msra.gmra.mxu0 %v250_v29 }
  0x51   : > { %716 = vmatpush3.bf16.msra.mxu1 %v804_v35 }
 0x110   : > { %v393_v41 = vpop.f32.mrf.mxu0 }
 0x111   : > { %v394_v48 = vadd.f32 %v393_v41, %v272_v43 }
 0x112   : > { %v395_v44 = vpop.f32.mrf.mxu0 }
 0x113   : > { %v396_v46 = vadd.f32 %v395_v44, %v276_v42  ;;  %v402_v54 = vmax.f32 %v394_v48, 0.0 }
 0x114   : > { %v397_v45 = vpop.f32.mrf.mxu0 }
 0x115   : > { %v398_v47 = vadd.f32 %v397_v45, %v272_v43  ;;  %v403_v52 = vmax.f32 %v396_v46, 0.0 }
 0x116   : > { %v399_v49 = vpop.f32.mrf.mxu0 }
 0x117   : > { %v400_v50 = vadd.f32 %v399_v49, %v276_v42  ;;  %v404_v51 = vmax.f32 %v398_v47, 0.0 }
 0x119   : > { %v405_v53 = vmax.f32 %v400_v50, 0.0  ;;  %v406_v56 = vpack.c.bf16 %v404_v51, %v402_v54 }
 0x11b   : > { %v407_v55 = vpack.c.bf16 %v405_v53, %v403_v52 }
 0x11d   : > { %575 = vmatprep.mubr.bf16.mxu1 %v407_v55 }
 0x11e   : > { %576 = vmatmul.mubr.bf16.vlgmr.msra.gmra.mxu1 %v406_v56 }
 0x1de   : > { %v717_v57 = vpop.f32.mrf.mxu1 }
 0x1e0   : > { %v718_v59 = vpop.f32.mrf.mxu1 }
 0x1e1   : > { %v719_v60 = vadd.f32 %v718_v59, %v717_v57 }
 0x1e2   : > { %v720_v61 = vpop.f32.mrf.mxu1 }
 0x1e3   : > { %v578_v62 = vadd.f32 %v719_v60, %v681_v58 }
 0x1e4   : > { %v721_v63 = vpop.f32.mrf.mxu1 }
 0x1e5   : > { %585 = vst.msk [vmem:[%s245_s11] sm:$0xff] %vm584_vm0, %v578_v62  ;;  %v722_v0 = vadd.f32 %v721_v63, %v720_v61 }
 0x1e7   : > { %v581_v1 = vadd.f32 %v722_v0, %v681_v58 }
 0x1e9   : > { %586 = vst.msk [vmem:[%s245_s11 + $0x8] sm:$0xff] %vm584_vm0, %v581_v1 }
 0x1ea PF: > { %p15_p9 = scmp.ge.s32.totalorder %s923_s23, 4   ;;  %s1123_s18 = smov %s859_s19 }
 0x1eb   : > { %s1124_s19 = smov %s863_s20  ;;  %s1125_s20 = smov %s933_s26 }
 0x1ec   : > { %s1126_s21 = smov %s923_s23  ;;  %17 = sbr.rel (!%p15_p9) target bundleno = 3 (0x3), region = 80 }
 0x1f1   :  { %609 = vsyncpa [#allocation3], 1 }
 0x1f2   :  { %611 = vsyncpa [#allocation3 + $0x1], 1 }

</bundles_post_ra>
